<compile_context>
chip_gen: v6e
topology: v6e:2x2x1
jax: 0.10.0
libtpu: 0.0.40
codegen_flags: <defaults>
</compile_context>

<pallas_src>
import jax
import jax.numpy as jnp
from jax import lax
from jax.experimental import pallas as pl
from jax.experimental.pallas import tpu as pltpu

PAD = 128  # lane-dense feature width for intermediates / output


def _layernorm_relu(y, gamma, beta, valid_width, padded_width):
    """LayerNorm(eps=1e-5, affine) over the first `valid_width` lanes, then ReLU.

    Assumes padded lanes of y are exactly zero (weights/bias are zero-padded),
    and gamma/beta are zero in padded lanes so padded lanes stay zero.
    """
    inv_n = 1.0 / float(valid_width)
    mean = jnp.sum(y, axis=-1, keepdims=True) * inv_n
    if valid_width < padded_width:
        lane = lax.broadcasted_iota(jnp.int32, (1, padded_width), 1)
        valid = (lane < valid_width).astype(y.dtype)
        centered = (y - mean) * valid
    else:
        centered = y - mean
    var = jnp.sum(centered * centered, axis=-1, keepdims=True) * inv_n
    y = centered * lax.rsqrt(var + 1e-5)
    y = y * gamma + beta
    return jnp.maximum(y, 0.0)


def _make_fused_kernel(layer_cfgs, pad_width):
    """Build one fused kernel: for each layer
         dropout(mask mul) -> (graph)conv/linear -> [layernorm -> relu]
    Ref order: features, then per layer [mask, (adj), w, b, (gamma, beta)], out.
    """

    def kernel(*refs):
        *in_refs, o_ref = refs
        it = iter(in_refs)
        h = next(it)[...]  # node features [N, D_in]

        for cfg in layer_cfgs:
            # dropout: mask already holds {0, 2} = {dropped, kept * 1/(1-p)}
            mask = next(it)[...]
            h = h * mask

            if cfg["is_gcn"]:
                a = next(it)[...]
                w = next(it)[...]
                b = next(it)[...]
                if cfg["aggregate_first"]:
                    # (A @ X) @ W : cheaper when current width < output width
                    h = jnp.dot(a, h, preferred_element_type=jnp.float32)
                    y = jnp.dot(h, w, preferred_element_type=jnp.float32)
                else:
                    # A @ (X @ W)
                    y = jnp.dot(h, w, preferred_element_type=jnp.float32)
                    y = jnp.dot(a, y, preferred_element_type=jnp.float32)
            else:
                w = next(it)[...]
                b = next(it)[...]
                y = jnp.dot(h, w, preferred_element_type=jnp.float32)

            y = y + b  # bias broadcast over nodes

            if cfg["apply_norm"]:
                gamma = next(it)[...]
                beta = next(it)[...]
                y = _layernorm_relu(y, gamma, beta, cfg["valid_out"], pad_width)

            h = y

        o_ref[...] = h

    return kernel


def _pad2d(x, rows, cols):
    """Zero-pad a 2D array to (rows, cols)."""
    out = jnp.zeros((rows, cols), x.dtype)
    return out.at[: x.shape[0], : x.shape[1]].set(x)


def gnn_forward(adjs, features, params, n_layers, n_linear, dropout_key):
    """Forward pass of GNNModel (gcn). adjs: list of dense normalized adjacencies
    (one per GCN layer). Single fused pallas_call; result is [N, n_classes]."""
    n_nodes, in_dim = features.shape
    n_classes = params[-1]["w"].shape[1]

    mask_keys = jax.random.split(dropout_key, n_layers)

    layer_cfgs = []
    inputs = [features]
    cur_width = in_dim  # actual (padded) lane width of h entering each layer

    for idx in range(n_layers):
        is_gcn = idx < n_layers - n_linear
        apply_norm = idx < n_layers - 1
        p = params[idx]
        d_in, d_out = p["w"].shape

        # dropout mask for this layer's input, pre-scaled to {0, 2} (p = 0.5)
        keep = jax.random.bernoulli(mask_keys[idx], p=0.5, shape=(n_nodes, cur_width))
        inputs.append(keep.astype(jnp.float32) * 2.0)

        if is_gcn:
            inputs.append(adjs[idx])

        # zero-pad weights / bias (/ LN params) to the lane-dense width
        inputs.append(_pad2d(p["w"], cur_width, PAD))
        inputs.append(_pad2d(p["b"].reshape(1, -1), 1, PAD))
        if apply_norm:
            inputs.append(_pad2d(p["gamma"].reshape(1, -1), 1, PAD))
            inputs.append(_pad2d(p["beta"].reshape(1, -1), 1, PAD))

        layer_cfgs.append(
            dict(
                is_gcn=is_gcn,
                apply_norm=apply_norm,
                valid_out=d_out,
                aggregate_first=is_gcn and (cur_width < PAD),
            )
        )
        cur_width = PAD  # every layer writes a lane-dense [N, 128] intermediate

    vmem = pl.BlockSpec(memory_space=pltpu.MemorySpace.VMEM)
    out_padded = pl.pallas_call(
        _make_fused_kernel(layer_cfgs, PAD),
        out_shape=jax.ShapeDtypeStruct((n_nodes, PAD), jnp.float32),
        in_specs=[vmem] * len(inputs),
        out_specs=vmem,
    )(*inputs)

    return out_padded[:, :n_classes]


def build_normalized_adj(key, n_nodes):
    """Dense random graph + DGL GraphConv 'both' normalization (glue, plain JAX)."""
    a = jax.random.bernoulli(key, p=0.3, shape=(n_nodes, n_nodes)).astype(jnp.float32)
    deg_in = jnp.maximum(a.sum(axis=1), 1.0)   # in-degree of dst (row = dst)
    deg_out = jnp.maximum(a.sum(axis=0), 1.0)  # out-degree of src (col = src)
    return (deg_in[:, None] ** -0.5) * a * (deg_out[None, :] ** -0.5)


if __name__ == "__main__":
    # hyperparameters
    N_NODES = 64
    INPUT_FEATURE_DIM = 16
    LAYER_DIM = 32
    N_CLASSES = 8
    N_LAYERS = 3
    N_LINEAR = 1
    dims = [INPUT_FEATURE_DIM] + [LAYER_DIM] * (N_LAYERS - 1) + [N_CLASSES]

    key = jax.random.PRNGKey(0)
    k_feat, k_adj, k_par, k_drop = jax.random.split(key, 4)

    # deterministic inputs
    features = jax.random.normal(k_feat, (N_NODES, INPUT_FEATURE_DIM), dtype=jnp.float32)
    adj_keys = jax.random.split(k_adj, N_LAYERS)
    adjs = [build_normalized_adj(adj_keys[i], N_NODES) for i in range(N_LAYERS)]

    # deterministic synthetic parameters
    params = []
    par_keys = jax.random.split(k_par, N_LAYERS)
    for idx in range(N_LAYERS):
        kw, _ = jax.random.split(par_keys[idx])
        p = {
            "w": 0.1 * jax.random.normal(kw, (dims[idx], dims[idx + 1]), dtype=jnp.float32),
            "b": jnp.zeros((dims[idx + 1],), dtype=jnp.float32),
        }
        if idx < N_LAYERS - 1:  # LayerNorm affine params
            p["gamma"] = jnp.ones((dims[idx + 1],), dtype=jnp.float32)
            p["beta"] = jnp.zeros((dims[idx + 1],), dtype=jnp.float32)
        params.append(p)

    out = gnn_forward(adjs, features, params, N_LAYERS, N_LINEAR, k_drop)
    out = jax.block_until_ready(out)
    assert out.shape == (N_NODES, N_CLASSES), out.shape
    assert jnp.all(jnp.isfinite(out))
    print("KERNEL_OK")
</pallas_src>

<mosaic_0001>
module attributes {stable_mosaic.version = 11 : i64} {
  func.func @kernel(%arg0: memref<64x16xf32, #tpu.memory_space<vmem>>, %arg1: memref<64x16xf32, #tpu.memory_space<vmem>>, %arg2: memref<64x64xf32, #tpu.memory_space<vmem>>, %arg3: memref<16x128xf32, #tpu.memory_space<vmem>>, %arg4: memref<1x128xf32, #tpu.memory_space<vmem>>, %arg5: memref<1x128xf32, #tpu.memory_space<vmem>>, %arg6: memref<1x128xf32, #tpu.memory_space<vmem>>, %arg7: memref<64x128xf32, #tpu.memory_space<vmem>>, %arg8: memref<64x64xf32, #tpu.memory_space<vmem>>, %arg9: memref<128x128xf32, #tpu.memory_space<vmem>>, %arg10: memref<1x128xf32, #tpu.memory_space<vmem>>, %arg11: memref<1x128xf32, #tpu.memory_space<vmem>>, %arg12: memref<1x128xf32, #tpu.memory_space<vmem>>, %arg13: memref<64x128xf32, #tpu.memory_space<vmem>>, %arg14: memref<128x128xf32, #tpu.memory_space<vmem>>, %arg15: memref<1x128xf32, #tpu.memory_space<vmem>>, %arg16: memref<64x128xf32, #tpu.memory_space<vmem>>) attributes {dimension_semantics = [], scalar_prefetch = 0 : i64, scratch_operands = 0 : i64, tpu.core_type = #tpu.core_type<tc>} {
    %c0 = arith.constant 0 : index
    %c0_0 = arith.constant 0 : index
    %0 = vector.load %arg0[%c0, %c0_0] : memref<64x16xf32, #tpu.memory_space<vmem>>, vector<64x16xf32>
    %c0_1 = arith.constant 0 : index
    %c0_2 = arith.constant 0 : index
    %1 = vector.load %arg1[%c0_1, %c0_2] : memref<64x16xf32, #tpu.memory_space<vmem>>, vector<64x16xf32>
    %2 = arith.mulf %0, %1 : vector<64x16xf32>
    %c0_3 = arith.constant 0 : index
    %c0_4 = arith.constant 0 : index
    %3 = vector.load %arg2[%c0_3, %c0_4] : memref<64x64xf32, #tpu.memory_space<vmem>>, vector<64x64xf32>
    %c0_5 = arith.constant 0 : index
    %c0_6 = arith.constant 0 : index
    %4 = vector.load %arg3[%c0_5, %c0_6] : memref<16x128xf32, #tpu.memory_space<vmem>>, vector<16x128xf32>
    %c0_7 = arith.constant 0 : index
    %c0_8 = arith.constant 0 : index
    %5 = vector.load %arg4[%c0_7, %c0_8] : memref<1x128xf32, #tpu.memory_space<vmem>>, vector<1x128xf32>
    %cst = arith.constant dense<0.000000e+00> : vector<64x16xf32>
    %6 = tpu.matmul %3, %2, %cst {dimension_numbers = #tpu.dot_dimension_numbers<[1], [0], [0], [1], [0, 0, 1, 1], [], []>} : vector<64x64xf32>, vector<64x16xf32>, vector<64x16xf32> -> vector<64x16xf32>
    %cst_9 = arith.constant dense<0.000000e+00> : vector<64x128xf32>
    %7 = tpu.matmul %6, %4, %cst_9 {dimension_numbers = #tpu.dot_dimension_numbers<[1], [0], [0], [1], [0, 0, 1, 1], [], []>} : vector<64x16xf32>, vector<16x128xf32>, vector<64x128xf32> -> vector<64x128xf32>
    %8 = vector.broadcast %5 : vector<1x128xf32> to vector<64x128xf32>
    %9 = arith.addf %7, %8 : vector<64x128xf32>
    %c0_10 = arith.constant 0 : index
    %c0_11 = arith.constant 0 : index
    %10 = vector.load %arg5[%c0_10, %c0_11] : memref<1x128xf32, #tpu.memory_space<vmem>>, vector<1x128xf32>
    %c0_12 = arith.constant 0 : index
    %c0_13 = arith.constant 0 : index
    %11 = vector.load %arg6[%c0_12, %c0_13] : memref<1x128xf32, #tpu.memory_space<vmem>>, vector<1x128xf32>
    %cst_14 = arith.constant dense<0.000000e+00> : vector<64xf32>
    %12 = vector.multi_reduction <add>, %9, %cst_14 [1] : vector<64x128xf32> to vector<64xf32>
    %13 = vector.shape_cast %12 : vector<64xf32> to vector<64x1xf32>
    %cst_15 = arith.constant 3.125000e-02 : f32
    %14 = vector.broadcast %cst_15 : f32 to vector<64x1xf32>
    %15 = arith.mulf %13, %14 : vector<64x1xf32>
    %16 = tpu.iota {dimensions = array<i32: 1>} : vector<1x128xi32>
    %c32_i32 = arith.constant 32 : i32
    %17 = vector.broadcast %c32_i32 : i32 to vector<1x128xi32>
    %18 = arith.cmpi slt, %16, %17 : vector<1x128xi32>
    %19 = arith.extui %18 : vector<1x128xi1> to vector<1x128xi32>
    %20 = arith.sitofp %19 : vector<1x128xi32> to vector<1x128xf32>
    %21 = vector.broadcast %15 : vector<64x1xf32> to vector<64x128xf32>
    %22 = arith.subf %9, %21 : vector<64x128xf32>
    %23 = vector.broadcast %20 : vector<1x128xf32> to vector<64x128xf32>
    %24 = arith.mulf %22, %23 : vector<64x128xf32>
    %25 = arith.mulf %24, %24 : vector<64x128xf32>
    %cst_16 = arith.constant dense<0.000000e+00> : vector<64xf32>
    %26 = vector.multi_reduction <add>, %25, %cst_16 [1] : vector<64x128xf32> to vector<64xf32>
    %27 = vector.shape_cast %26 : vector<64xf32> to vector<64x1xf32>
    %cst_17 = arith.constant 3.125000e-02 : f32
    %28 = vector.broadcast %cst_17 : f32 to vector<64x1xf32>
    %29 = arith.mulf %27, %28 : vector<64x1xf32>
    %cst_18 = arith.constant 9.99999974E-6 : f32
    %30 = vector.broadcast %cst_18 : f32 to vector<64x1xf32>
    %31 = arith.addf %29, %30 : vector<64x1xf32>
    %32 = math.rsqrt %31 : vector<64x1xf32>
    %33 = vector.broadcast %32 : vector<64x1xf32> to vector<64x128xf32>
    %34 = arith.mulf %24, %33 : vector<64x128xf32>
    %35 = vector.broadcast %10 : vector<1x128xf32> to vector<64x128xf32>
    %36 = arith.mulf %34, %35 : vector<64x128xf32>
    %37 = vector.broadcast %11 : vector<1x128xf32> to vector<64x128xf32>
    %38 = arith.addf %36, %37 : vector<64x128xf32>
    %cst_19 = arith.constant 0.000000e+00 : f32
    %39 = vector.broadcast %cst_19 : f32 to vector<64x128xf32>
    %40 = arith.maximumf %38, %39 : vector<64x128xf32>
    %c0_20 = arith.constant 0 : index
    %c0_21 = arith.constant 0 : index
    %41 = vector.load %arg7[%c0_20, %c0_21] : memref<64x128xf32, #tpu.memory_space<vmem>>, vector<64x128xf32>
    %42 = arith.mulf %40, %41 : vector<64x128xf32>
    %c0_22 = arith.constant 0 : index
    %c0_23 = arith.constant 0 : index
    %43 = vector.load %arg8[%c0_22, %c0_23] : memref<64x64xf32, #tpu.memory_space<vmem>>, vector<64x64xf32>
    %c0_24 = arith.constant 0 : index
    %c0_25 = arith.constant 0 : index
    %44 = vector.load %arg9[%c0_24, %c0_25] : memref<128x128xf32, #tpu.memory_space<vmem>>, vector<128x128xf32>
    %c0_26 = arith.constant 0 : index
    %c0_27 = arith.constant 0 : index
    %45 = vector.load %arg10[%c0_26, %c0_27] : memref<1x128xf32, #tpu.memory_space<vmem>>, vector<1x128xf32>
    %cst_28 = arith.constant dense<0.000000e+00> : vector<64x128xf32>
    %46 = tpu.matmul %42, %44, %cst_28 {dimension_numbers = #tpu.dot_dimension_numbers<[1], [0], [0], [1], [0, 0, 1, 1], [], []>} : vector<64x128xf32>, vector<128x128xf32>, vector<64x128xf32> -> vector<64x128xf32>
    %cst_29 = arith.constant dense<0.000000e+00> : vector<64x128xf32>
    %47 = tpu.matmul %43, %46, %cst_29 {dimension_numbers = #tpu.dot_dimension_numbers<[1], [0], [0], [1], [0, 0, 1, 1], [], []>} : vector<64x64xf32>, vector<64x128xf32>, vector<64x128xf32> -> vector<64x128xf32>
    %48 = vector.broadcast %45 : vector<1x128xf32> to vector<64x128xf32>
    %49 = arith.addf %47, %48 : vector<64x128xf32>
    %c0_30 = arith.constant 0 : index
    %c0_31 = arith.constant 0 : index
    %50 = vector.load %arg11[%c0_30, %c0_31] : memref<1x128xf32, #tpu.memory_space<vmem>>, vector<1x128xf32>
    %c0_32 = arith.constant 0 : index
    %c0_33 = arith.constant 0 : index
    %51 = vector.load %arg12[%c0_32, %c0_33] : memref<1x128xf32, #tpu.memory_space<vmem>>, vector<1x128xf32>
    %cst_34 = arith.constant dense<0.000000e+00> : vector<64xf32>
    %52 = vector.multi_reduction <add>, %49, %cst_34 [1] : vector<64x128xf32> to vector<64xf32>
    %53 = vector.shape_cast %52 : vector<64xf32> to vector<64x1xf32>
    %cst_35 = arith.constant 3.125000e-02 : f32
    %54 = vector.broadcast %cst_35 : f32 to vector<64x1xf32>
    %55 = arith.mulf %53, %54 : vector<64x1xf32>
    %56 = tpu.iota {dimensions = array<i32: 1>} : vector<1x128xi32>
    %c32_i32_36 = arith.constant 32 : i32
    %57 = vector.broadcast %c32_i32_36 : i32 to vector<1x128xi32>
    %58 = arith.cmpi slt, %56, %57 : vector<1x128xi32>
    %59 = arith.extui %58 : vector<1x128xi1> to vector<1x128xi32>
    %60 = arith.sitofp %59 : vector<1x128xi32> to vector<1x128xf32>
    %61 = vector.broadcast %55 : vector<64x1xf32> to vector<64x128xf32>
    %62 = arith.subf %49, %61 : vector<64x128xf32>
    %63 = vector.broadcast %60 : vector<1x128xf32> to vector<64x128xf32>
    %64 = arith.mulf %62, %63 : vector<64x128xf32>
    %65 = arith.mulf %64, %64 : vector<64x128xf32>
    %cst_37 = arith.constant dense<0.000000e+00> : vector<64xf32>
    %66 = vector.multi_reduction <add>, %65, %cst_37 [1] : vector<64x128xf32> to vector<64xf32>
    %67 = vector.shape_cast %66 : vector<64xf32> to vector<64x1xf32>
    %cst_38 = arith.constant 3.125000e-02 : f32
    %68 = vector.broadcast %cst_38 : f32 to vector<64x1xf32>
    %69 = arith.mulf %67, %68 : vector<64x1xf32>
    %cst_39 = arith.constant 9.99999974E-6 : f32
    %70 = vector.broadcast %cst_39 : f32 to vector<64x1xf32>
    %71 = arith.addf %69, %70 : vector<64x1xf32>
    %72 = math.rsqrt %71 : vector<64x1xf32>
    %73 = vector.broadcast %72 : vector<64x1xf32> to vector<64x128xf32>
    %74 = arith.mulf %64, %73 : vector<64x128xf32>
    %75 = vector.broadcast %50 : vector<1x128xf32> to vector<64x128xf32>
    %76 = arith.mulf %74, %75 : vector<64x128xf32>
    %77 = vector.broadcast %51 : vector<1x128xf32> to vector<64x128xf32>
    %78 = arith.addf %76, %77 : vector<64x128xf32>
    %cst_40 = arith.constant 0.000000e+00 : f32
    %79 = vector.broadcast %cst_40 : f32 to vector<64x128xf32>
    %80 = arith.maximumf %78, %79 : vector<64x128xf32>
    %c0_41 = arith.constant 0 : index
    %c0_42 = arith.constant 0 : index
    %81 = vector.load %arg13[%c0_41, %c0_42] : memref<64x128xf32, #tpu.memory_space<vmem>>, vector<64x128xf32>
    %82 = arith.mulf %80, %81 : vector<64x128xf32>
    %c0_43 = arith.constant 0 : index
    %c0_44 = arith.constant 0 : index
    %83 = vector.load %arg14[%c0_43, %c0_44] : memref<128x128xf32, #tpu.memory_space<vmem>>, vector<128x128xf32>
    %c0_45 = arith.constant 0 : index
    %c0_46 = arith.constant 0 : index
    %84 = vector.load %arg15[%c0_45, %c0_46] : memref<1x128xf32, #tpu.memory_space<vmem>>, vector<1x128xf32>
    %cst_47 = arith.constant dense<0.000000e+00> : vector<64x128xf32>
    %85 = tpu.matmul %82, %83, %cst_47 {dimension_numbers = #tpu.dot_dimension_numbers<[1], [0], [0], [1], [0, 0, 1, 1], [], []>} : vector<64x128xf32>, vector<128x128xf32>, vector<64x128xf32> -> vector<64x128xf32>
    %86 = vector.broadcast %84 : vector<1x128xf32> to vector<64x128xf32>
    %87 = arith.addf %85, %86 : vector<64x128xf32>
    %c0_48 = arith.constant 0 : index
    %c0_49 = arith.constant 0 : index
    %88 = vector.load %arg16[%c0_48, %c0_49] : memref<64x128xf32, #tpu.memory_space<vmem>>, vector<64x128xf32>
    tpu.vector_store %arg16[%c0_48, %c0_49], %87 {strides = array<i32>} : memref<64x128xf32, #tpu.memory_space<vmem>>, vector<64x128xf32>,
    return
  }
}

</mosaic_0001>

<bundles_post_ra>
// kernel: tpu_custom_call.1
= control target key start
LH: loop header
LB: loop body
LE: loop exit
PB: predicated region body
PF: predicated region fallthrough
CT: control target
= control target key end

     0   :  { %s1966_s0 = inlined_call_operand.vmem [shape: f32[64,16], index: 0, kind: input, shape index: {}]   ;;  %s1967_s1 = inlined_call_operand.vmem [shape: f32[64,16], index: 1, kind: input, shape index: {}]   ;;  %s1968_s2 = inlined_call_operand.hbm [shape: f32[64,64], index: 2, kind: input, shape index: {}]   ;;  %s1969_s3 = inlined_call_operand.vmem [shape: f32[16,128], index: 3, kind: input, shape index: {}]   ;;  %s1970_s4 = inlined_call_operand.vmem [shape: f32[1,128], index: 4, kind: input, shape index: {}]   ;;  %s1971_s5 = inlined_call_operand.vmem [shape: f32[1,128], index: 5, kind: input, shape index: {}]   ;;  %s1972_s6 = inlined_call_operand.vmem [shape: f32[1,128], index: 6, kind: input, shape index: {}]   ;;  %s1973_s7 = inlined_call_operand.hbm [shape: f32[64,128], index: 7, kind: input, shape index: {}]   ;;  %s1974_s8 = inlined_call_operand.hbm [shape: f32[64,64], index: 8, kind: input, shape index: {}]   ;;  %s1975_s9 = inlined_call_operand.vmem [shape: f32[128,128], index: 9, kind: input, shape index: {}]   ;;  %s1976_s10 = inlined_call_operand.vmem [shape: f32[1,128], index: 10, kind: input, shape index: {}]   ;;  %s1977_s11 = inlined_call_operand.vmem [shape: f32[1,128], index: 11, kind: input, shape index: {}]   ;;  %s1978_s12 = inlined_call_operand.vmem [shape: f32[1,128], index: 12, kind: input, shape index: {}]   ;;  %s1979_s13 = inlined_call_operand.hbm [shape: f32[64,128], index: 13, kind: input, shape index: {}]   ;;  %s1980_s14 = inlined_call_operand.hbm [shape: f32[128,128], index: 14, kind: input, shape index: {}]   ;;  %s1981_s15 = inlined_call_operand.vmem [shape: f32[1,128], index: 15, kind: input, shape index: {}]   ;;  %s1982_s16 = inlined_call_operand.hbm [shape: f32[64,128], index: 16, kind: output, shape index: {}]  }
   0x1   :  { %1984 = sst [smem:[#allocation16_spill]] %s1966_s0 }
   0x2   :  { %21 = vsyncpa [#allocation3], 0 }
   0x3   :  { %22 = vsyncpa [#allocation6], 0 }
   0x4   :  { %23 = vsyncpa [#allocation9], 0 }
   0x5   :  { %24 = vsyncpa [#allocation4], 0  ;;  %s1599_s21 = smov [#allocation5]   ;;  %s1600_s23 = smov [#allocation8]  }
   0x6   :  { %s54_s22 = sshll.u32 %s1599_s21, 4  ;;  %s86_s24 = sshll.u32 %s1600_s23, 4  ;;  %s55_s22 = int_to_ptr.vmem [resolvable:$true] %s54_s22  ;;  %s87_s24 = int_to_ptr.vmem [resolvable:$true] %s86_s24 }
   0x7   :  { %s1479_s25 = scalar_lea.vmem %s55_s22, 1024  ;;  %p1484_p1 = scmp.lt.s32.totalorder %s55_s22, %s55_s22 }
   0x8   :  { %p1480_p0 = scmp.ne.s32.totalorder %s55_s22, %s1479_s25  ;;  %p1485_p2 = scmp.lt.s32.totalorder %s1479_s25, %s1479_s25 }
   0xa   :  { %p1486_p3 = por %p1485_p2, %p1484_p1 }
   0xc   :  { %p1487_p4 = pnand %p1486_p3, %p1480_p0 }
   0xe   :  { %1490 = shalt.err (!%p1487_p4)
}
   0xf   :  { %s1601_s26 = smov 128   ;;  %s1602_s27 = smov 8  }
  0x10   :  { %60 = dma.hbm_to_vmem [thread:$0]  %s1973_s7, 1024, %s55_s22, [#allocation6], %s1601_s26, %s1601_s26, %s1602_s27  }
  0x11   :  { %s1499_s30 = scalar_lea.vmem %s87_s24, 1024  ;;  %p1504_p6 = scmp.lt.s32.totalorder %s87_s24, %s87_s24 }
  0x12   :  { %p1500_p5 = scmp.ne.s32.totalorder %s87_s24, %s1499_s30  ;;  %p1505_p7 = scmp.lt.s32.totalorder %s1499_s30, %s1499_s30 }
  0x14   :  { %p1506_p8 = por %p1505_p7, %p1504_p6 }
  0x16   :  { %p1507_p9 = pnand %p1506_p8, %p1500_p5 }
  0x18   :  { %1510 = shalt.err (!%p1507_p9)
}
  0x19   :  { %92 = dma.hbm_to_vmem [thread:$0]  %s1979_s13, 1024, %s87_s24, [#allocation9], %s1601_s26, %s1601_s26, %s1602_s27  }
  0x1a   :  { %s1603_s18 = smov [#allocation2]   ;;  %s1604_s20 = smov [#allocation7]  }
  0x1b   :  { %s34_s19 = sshll.u32 %s1603_s18, 4  ;;  %s66_s21 = sshll.u32 %s1604_s20, 4  ;;  %s35_s19 = int_to_ptr.vmem [resolvable:$true] %s34_s19  ;;  %s67_s21 = int_to_ptr.vmem [resolvable:$true] %s66_s21 }
  0x1c   :  { %s1519_s7 = scalar_lea.vmem %s35_s19, 1024  ;;  %p1524_p11 = scmp.lt.s32.totalorder %s35_s19, %s35_s19 }
  0x1d   :  { %p1520_p10 = scmp.ne.s32.totalorder %s35_s19, %s1519_s7  ;;  %p1525_p12 = scmp.lt.s32.totalorder %s1519_s7, %s1519_s7 }
  0x1f   :  { %p1526_p13 = por %p1525_p12, %p1524_p11 }
  0x21   :  { %p1527_p0 = pnand %p1526_p13, %p1520_p10 }
  0x23   :  { %1530 = shalt.err (!%p1527_p0)
}
  0x24   :  { %40 = dma.hbm_to_vmem [thread:$0]  %s1968_s2, 1024, %s35_s19, [#allocation3], %s1601_s26, %s1601_s26, %s1602_s27  }
  0x25   :  { %s1539_s13 = scalar_lea.vmem %s67_s21, 1024  ;;  %p1544_p2 = scmp.lt.s32.totalorder %s67_s21, %s67_s21 }
  0x26   :  { %p1540_p1 = scmp.ne.s32.totalorder %s67_s21, %s1539_s13  ;;  %p1545_p3 = scmp.lt.s32.totalorder %s1539_s13, %s1539_s13 }
  0x28   :  { %p1546_p4 = por %p1545_p3, %p1544_p2 }
  0x2a   :  { %p1547_p5 = pnand %p1546_p4, %p1540_p1 }
  0x2c   :  { %1550 = shalt.err (!%p1547_p5)
}
  0x2d   :  { %72 = dma.hbm_to_vmem [thread:$0]  %s1974_s8, 1024, %s67_s21, [#allocation6], %s1601_s26, %s1601_s26, %s1602_s27  }
  0x2e   :  { %s1605_s28 = smov [#allocation10]  }
  0x2f   :  { %s98_s29 = sshll.u32 %s1605_s28, 4  ;;  %s99_s29 = int_to_ptr.vmem [resolvable:$true] %s98_s29 }
  0x30   :  { %s1559_s30 = scalar_lea.vmem %s99_s29, 2048  ;;  %p1564_p7 = scmp.lt.s32.totalorder %s99_s29, %s99_s29 }
  0x31   :  { %p1560_p6 = scmp.ne.s32.totalorder %s99_s29, %s1559_s30  ;;  %p1565_p8 = scmp.lt.s32.totalorder %s1559_s30, %s1559_s30 }
  0x33   :  { %p1566_p9 = por %p1565_p8, %p1564_p7 }
  0x35   :  { %p1567_p10 = pnand %p1566_p9, %p1560_p6 }
  0x37   :  { %1570 = shalt.err (!%p1567_p10)
}
  0x38   :  { %104 = dma.hbm_to_vmem [thread:$0]  %s1980_s14, 2048, %s99_s29, [#allocation9], %s1601_s26, %s1601_s26, %s1602_s27  }
  0x39   :  { %1591 = dma.done.wait [#allocation3], 1024  }
  0x3a   :  { %1592 = vsyncadd [#allocation3], 4294966272 }
  0x3b   :  { %1593 = dma.done.wait [#allocation6], 2048  }
  0x3c   :  { %1594 = vsyncadd [#allocation6], 4294965248 }
  0x3d   :  { %1595 = dma.done.wait [#allocation9], 3072  }
  0x3e   :  { %1596 = vsyncadd [#allocation9], 4294964224  ;;  %s1985_s18 = sld [smem:[#allocation16_spill]]  ;;  %v137_v1 = vld [vmem:[%s1967_s1 + $0x38] sm:$0xff]  ;;  %v136_v4 = vld [vmem:[%s1967_s1 + $0x30] sm:$0xff]  ;;  %vm157_vm0 = vcmask 523264   ;;  %v449_v59 = vlaneseq }
  0x3f   :  { %v135_v6 = vld [vmem:[%s1967_s1 + $0x28] sm:$0xff]  ;;  %v134_v9 = vld [vmem:[%s1967_s1 + $0x20] sm:$0xff]  ;;  %v133_v12 = vld [vmem:[%s1967_s1 + $0x18] sm:$0xff]  ;;  %vm293_vm1 = vcmask 130048   ;;  %v1606_v63 = vmov 0.0   ;;  %s1607_s2 = smov [#allocation11]  }
  0x40   :  { %v146_v14 = vld [vmem:[#allocation2] sm:$0xff]  ;;  %v132_v16 = vld [vmem:[%s1967_s1 + $0x10] sm:$0xff]  ;;  %v131_v19 = vld [vmem:[%s1967_s1 + $0x8] sm:$0xff]  ;;  %v450_v60 = vand.u32 127, %v449_v59 }
  0x41   :  { %1286 = vmatprep.mubr.msk.f32.mxu0 %vm157_vm0, %v146_v14  ;;  %v130_v22 = vld [vmem:[%s1967_s1] sm:$0xff]  ;;  %v147_v25 = vld [vmem:[#allocation2 + $0x8] sm:$0xff]  ;;  %v148_v26 = vld [vmem:[#allocation2 + $0x10] sm:$0xff] }
  0x42   :  { %v149_v27 = vld [vmem:[#allocation2 + $0x18] sm:$0xff]  ;;  %v150_v28 = vld [vmem:[#allocation2 + $0x20] sm:$0xff]  ;;  %v151_v29 = vld [vmem:[#allocation2 + $0x28] sm:$0xff]  ;;  %vm451_vm2 = vcmp.lt.s32.totalorder %v450_v60, 32 }
  0x43   :  { %v152_v30 = vld [vmem:[#allocation2 + $0x30] sm:$0xff]  ;;  %v153_v31 = vld [vmem:[#allocation2 + $0x38] sm:$0xff]  ;;  %v155_v32 = vld [vmem:[%s1969_s3 + $0x8] sm:$0xff] }
  0x44   :  { %v129_v0 = vld [vmem:[%s1985_s18 + $0x38] sm:$0xff]  ;;  %v128_v2 = vld [vmem:[%s1985_s18 + $0x30] sm:$0xff]  ;;  %v127_v5 = vld [vmem:[%s1985_s18 + $0x28] sm:$0xff]  ;;  %1298 = vmatprep.subr.mxu1 %v155_v32 }
  0x45   :  { %v145_v3 = vmul.f32 %v137_v1, %v129_v0  ;;  %v144_v7 = vmul.f32 %v136_v4, %v128_v2  ;;  %v126_v8 = vld [vmem:[%s1985_s18 + $0x20] sm:$0xff]  ;;  %v143_v10 = vmul.f32 %v135_v6, %v127_v5  ;;  %v125_v11 = vld [vmem:[%s1985_s18 + $0x18] sm:$0xff]  ;;  %v124_v15 = vld [vmem:[%s1985_s18 + $0x10] sm:$0xff]  ;;  %1299 = vmatpush3.msra.mxu1 %v155_v32  ;;  %v1788_v0 = vsel %vm451_vm2, 1.0, %v1606_v63 }
  0x46   :  { %v142_v13 = vmul.f32 %v134_v9, %v126_v8  ;;  %v141_v17 = vmul.f32 %v133_v12, %v125_v11  ;;  %v123_v18 = vld [vmem:[%s1985_s18 + $0x8] sm:$0xff]  ;;  %v140_v20 = vmul.f32 %v132_v16, %v124_v15  ;;  %v122_v21 = vld [vmem:[%s1985_s18] sm:$0xff] }
  0x47   :  { %1270 = vmatprep.subr.mxu0 %v145_v3  ;;  %v139_v23 = vmul.f32 %v131_v19, %v123_v18  ;;  %v138_v24 = vmul.f32 %v130_v22, %v122_v21  ;;  %v154_v33 = vld [vmem:[%s1969_s3] sm:$0xff] }
  0x48   :  { %1271 = vmatpush3.msra.mxu0 %v145_v3  ;;  %1300 = vmatprep.subr.mxu1 %v154_v33  ;;  %v1156_v43 = vld [vmem:[%s1970_s4] ss:$0 sm:$0xff] }
  0x49   :  { %1272 = vmatprep.subr.mxu0 %v144_v7  ;;  %1301 = vmatpush3.msra.mxu1 %v154_v33 }
  0x4a   :  { %1273 = vmatpush3.msra.mxu0 %v144_v7 }
  0x4b   :  { %1274 = vmatprep.subr.mxu0 %v143_v10 }
  0x4c   :  { %1275 = vmatpush3.msra.mxu0 %v143_v10 }
  0x4d   :  { %1276 = vmatprep.subr.mxu0 %v142_v13 }
  0x4e   :  { %1277 = vmatpush3.msra.mxu0 %v142_v13 }
  0x4f   :  { %1278 = vmatprep.subr.mxu0 %v141_v17 }
  0x50   :  { %1279 = vmatpush3.msra.mxu0 %v141_v17 }
  0x51   :  { %1280 = vmatprep.subr.mxu0 %v140_v20 }
  0x52   :  { %1281 = vmatpush3.msra.mxu0 %v140_v20 }
  0x53   :  { %1282 = vmatprep.subr.mxu0 %v139_v23 }
  0x54   :  { %1283 = vmatpush3.msra.mxu0 %v139_v23 }
  0x55   :  { %1284 = vmatprep.subr.mxu0 %v138_v24 }
  0x56   :  { %1285 = vmatpush3.msra.mxu0 %v138_v24 }
  0x57   :  { %1287 = vmatmul.mubr.msk.f32.vlgmr.msra.gmra.mxu0 %vm157_vm0, %v147_v25 }
  0x58   :  { %1289 = vmatprep.mubr.msk.f32.mxu0 %vm157_vm0, %v148_v26 }
  0x5b   :  { %1290 = vmatmul.mubr.msk.f32.gmra.mxu0 %vm157_vm0, %v149_v27 }
  0x5c   :  { %1292 = vmatprep.mubr.msk.f32.mxu0 %vm157_vm0, %v150_v28 }
  0x5f   :  { %1293 = vmatmul.mubr.msk.f32.gmra.mxu0 %vm157_vm0, %v151_v29 }
  0x60   :  { %1295 = vmatprep.mubr.msk.f32.mxu0 %vm157_vm0, %v152_v30 }
  0x63   :  { %1296 = vmatmul.mubr.msk.f32.gmra.mxu0 %vm157_vm0, %v153_v31 }
 0x117   :  { %v1288_v34 = vpop.f32.mrf.mxu0 }
 0x119   :  { %v248_v35 = vpop.f32.mrf.mxu0 }
 0x11a   :  { %1302 = vmatprep.mubr.msk.f32.mxu1 %vm293_vm1, %v248_v35 }
 0x11b   :  { %v1291_v36 = vpop.f32.mrf.mxu0  ;;  %1303 = vmatmul.mubr.msk.f32.vlgmr.msra.gmra.mxu1 %vm293_vm1, %v1288_v34  ;;  %v601_v34 = vld [vmem:[%s1975_s9 + $0x78] sm:$0xff] }
 0x11c   :  { %1314 = vmatprep.subr.mxu1 %v601_v34 }
 0x11d   :  { %v258_v37 = vpop.f32.mrf.mxu0  ;;  %1315 = vmatpush3.msra.mxu1 %v601_v34 }
 0x11e   :  { %1305 = vmatprep.mubr.msk.f32.mxu1 %vm293_vm1, %v258_v37 }
 0x11f   :  { %v1294_v38 = vpop.f32.mrf.mxu0  ;;  %1306 = vmatmul.mubr.msk.f32.gmra.mxu1 %vm293_vm1, %v1291_v36 }
 0x121   :  { %v268_v39 = vpop.f32.mrf.mxu0 }
 0x122   :  { %1308 = vmatprep.mubr.msk.f32.mxu1 %vm293_vm1, %v268_v39 }
 0x123   :  { %v1297_v40 = vpop.f32.mrf.mxu0  ;;  %1309 = vmatmul.mubr.msk.f32.gmra.mxu1 %vm293_vm1, %v1294_v38  ;;  %v600_v38 = vld [vmem:[%s1975_s9 + $0x70] sm:$0xff] }
 0x124   :  { %1316 = vmatprep.subr.mxu1 %v600_v38 }
 0x125   :  { %v278_v41 = vpop.f32.mrf.mxu0  ;;  %1317 = vmatpush3.msra.mxu1 %v600_v38 }
 0x126   :  { %1311 = vmatprep.mubr.msk.f32.mxu1 %vm293_vm1, %v278_v41  ;;  %v599_v41 = vld [vmem:[%s1975_s9 + $0x68] sm:$0xff] }
 0x127   :  { %1312 = vmatmul.mubr.msk.f32.gmra.mxu1 %vm293_vm1, %v1297_v40  ;;  %1318 = vmatprep.subr.mxu1 %v599_v41 }
 0x128   :  { %1319 = vmatpush3.msra.mxu1 %v599_v41 }
 0x1db   :  { %v1304_v42 = vpop.f32.mrf.mxu1 }
 0x1dc   :  { %v390_v48 = vadd.f32 %v1304_v42, %v1156_v43  ;;  %v598_v42 = vld [vmem:[%s1975_s9 + $0x60] sm:$0xff] }
 0x1dd   :  { %v384_v44 = vpop.f32.mrf.mxu1  ;;  %1320 = vmatprep.subr.mxu1 %v598_v42 }
 0x1de   :  { %v385_v45 = vadd.f32 %v1156_v43, %v384_v44  ;;  %1321 = vmatpush3.msra.mxu1 %v598_v42  ;;  %v596_v44 = vld [vmem:[%s1975_s9 + $0x50] sm:$0xff]  ;;  %v563_v42 = vld [vmem:[#allocation5 + $0x8] sm:$0xff] }
 0x1df   :  { %v1307_v46 = vpop.f32.mrf.mxu1 }
 0x1e0   :  { %425 = vadd.xlane.f32.xlu0 %v385_v45  ;;  %v400_v52 = vadd.f32 %v1307_v46, %v1156_v43  ;;  %v594_v46 = vld [vmem:[%s1975_s9 + $0x40] sm:$0xff] }
 0x1e1   :  { %v394_v47 = vpop.f32.mrf.mxu1 }
 0x1e2   :  { %v395_v49 = vadd.f32 %v1156_v43, %v394_v47  ;;  %v593_v47 = vld [vmem:[%s1975_s9 + $0x38] sm:$0xff] }
 0x1e3   :  { %v1310_v50 = vpop.f32.mrf.mxu1 }
 0x1e4   :  { %427 = vadd.xlane.f32.xlu0 %v390_v48  ;;  %429 = vadd.xlane.f32.xlu1 %v395_v49  ;;  %v410_v56 = vadd.f32 %v1310_v50, %v1156_v43  ;;  %v590_v50 = vld [vmem:[%s1975_s9 + $0x20] sm:$0xff] }
 0x1e5   :  { %v404_v51 = vpop.f32.mrf.mxu1 }
 0x1e6   :  { %v405_v53 = vadd.f32 %v1156_v43, %v404_v51  ;;  %v589_v51 = vld [vmem:[%s1975_s9 + $0x18] sm:$0xff] }
 0x1e7   :  { %v1313_v54 = vpop.f32.mrf.mxu1 }
 0x1e8   :  { %431 = vadd.xlane.f32.xlu1 %v400_v52  ;;  %433 = vadd.xlane.f32.xlu0 %v405_v53  ;;  %v420_v58 = vadd.f32 %v1313_v54, %v1156_v43  ;;  %v586_v54 = vld [vmem:[%s1975_s9] sm:$0xff] }
 0x1e9   :  { %v414_v55 = vpop.f32.mrf.mxu1 }
 0x1ea   :  { %v415_v57 = vadd.f32 %v1156_v43, %v414_v55  ;;  %v597_v43 = vld [vmem:[%s1975_s9 + $0x58] sm:$0xff] }
 0x1eb   :  { %1322 = vmatprep.subr.mxu1 %v597_v43 }
 0x1ec   :  { %435 = vadd.xlane.f32.xlu1 %v410_v56  ;;  %437 = vadd.xlane.f32.xlu0 %v415_v57 }
 0x1ed   :  { %1323 = vmatpush3.msra.mxu1 %v597_v43 }
 0x1ee   :  { %1324 = vmatprep.subr.mxu1 %v596_v44 }
 0x1ef   :  { %1325 = vmatpush3.msra.mxu1 %v596_v44 }
 0x1f0   :  { %439 = vadd.xlane.f32.xlu1 %v420_v58 }
 0x269   :  { %v426_v61 = vpop.xlane.xlu0 %425 }
 0x26a   :  { %v441_v62 = vmul.f32 0.03125, %v426_v61 }
 0x26c   :  { %v454_v1 = vsub.f32 %v385_v45, %v441_v62  ;;  %v595_v45 = vld [vmem:[%s1975_s9 + $0x48] sm:$0xff] }
 0x26d   :  { %v428_v2 = vpop.xlane.xlu0 %427  ;;  %v430_v3 = vpop.xlane.xlu1 %429  ;;  %1326 = vmatprep.subr.mxu1 %v595_v45 }
 0x26e   :  { %v442_v4 = vmul.f32 0.03125, %v428_v2  ;;  %v443_v5 = vmul.f32 0.03125, %v430_v3  ;;  %v1791_v6 = vmul.f32 %v1788_v0, %v454_v1  ;;  %1327 = vmatpush3.msra.mxu1 %v595_v45 }
 0x26f   :  { %1328 = vmatprep.subr.mxu1 %v594_v46 }
 0x270   :  { %v455_v7 = vsub.f32 %v390_v48, %v442_v4  ;;  %v456_v8 = vsub.f32 %v395_v49, %v443_v5  ;;  %v470_v9 = vmul.f32 %v1791_v6, %v1791_v6  ;;  %1329 = vmatpush3.msra.mxu1 %v594_v46  ;;  %v592_v48 = vld [vmem:[%s1975_s9 + $0x30] sm:$0xff]  ;;  %v591_v49 = vld [vmem:[%s1975_s9 + $0x28] sm:$0xff] }
 0x271   :  { %v432_v10 = vpop.xlane.xlu1 %431  ;;  %v434_v11 = vpop.xlane.xlu0 %433  ;;  %1330 = vmatprep.subr.mxu1 %v593_v47 }
 0x272   :  { %v444_v12 = vmul.f32 0.03125, %v432_v10  ;;  %v445_v13 = vmul.f32 0.03125, %v434_v11  ;;  %478 = vadd.xlane.f32.xlu0 %v470_v9  ;;  %v1796_v14 = vmul.f32 %v1788_v0, %v455_v7  ;;  %v1799_v15 = vmul.f32 %v1788_v0, %v456_v8  ;;  %1331 = vmatpush3.msra.mxu1 %v593_v47 }
 0x273   :  { %1332 = vmatprep.subr.mxu1 %v592_v48 }
 0x274   :  { %v457_v16 = vsub.f32 %v400_v52, %v444_v12  ;;  %v458_v17 = vsub.f32 %v405_v53, %v445_v13  ;;  %v471_v18 = vmul.f32 %v1796_v14, %v1796_v14  ;;  %v472_v19 = vmul.f32 %v1799_v15, %v1799_v15  ;;  %1333 = vmatpush3.msra.mxu1 %v592_v48  ;;  %v588_v52 = vld [vmem:[%s1975_s9 + $0x10] sm:$0xff]  ;;  %v587_v53 = vld [vmem:[%s1975_s9 + $0x8] sm:$0xff] }
 0x275   :  { %v436_v20 = vpop.xlane.xlu1 %435  ;;  %v438_v21 = vpop.xlane.xlu0 %437  ;;  %1334 = vmatprep.subr.mxu1 %v591_v49 }
 0x276   :  { %v446_v22 = vmul.f32 0.03125, %v436_v20  ;;  %v447_v23 = vmul.f32 0.03125, %v438_v21  ;;  %480 = vadd.xlane.f32.xlu1 %v471_v18  ;;  %482 = vadd.xlane.f32.xlu0 %v472_v19  ;;  %v1806_v24 = vmul.f32 %v1788_v0, %v457_v16  ;;  %v1809_v25 = vmul.f32 %v1788_v0, %v458_v17  ;;  %v1166_v19 = vld [vmem:[%s1971_s5] ss:$0 sm:$0xff] }
 0x277   :  { %1335 = vmatpush3.msra.mxu1 %v591_v49 }
 0x278   :  { %v459_v26 = vsub.f32 %v410_v56, %v446_v22  ;;  %v460_v27 = vsub.f32 %v415_v57, %v447_v23  ;;  %v473_v28 = vmul.f32 %v1806_v24, %v1806_v24  ;;  %v474_v29 = vmul.f32 %v1809_v25, %v1809_v25  ;;  %1336 = vmatprep.subr.mxu1 %v590_v50  ;;  %v1167_v22 = vld [vmem:[%s1972_s6] ss:$0 sm:$0xff] }
 0x279   :  { %v440_v30 = vpop.xlane.xlu1 %439  ;;  %1337 = vmatpush3.msra.mxu1 %v590_v50 }
 0x27a   :  { %v448_v31 = vmul.f32 0.03125, %v440_v30  ;;  %484 = vadd.xlane.f32.xlu1 %v473_v28  ;;  %486 = vadd.xlane.f32.xlu0 %v474_v29  ;;  %v1816_v32 = vmul.f32 %v1788_v0, %v459_v26  ;;  %v1819_v33 = vmul.f32 %v1788_v0, %v460_v27  ;;  %v562_v30 = vld [vmem:[#allocation5] sm:$0xff] }
 0x27b   :  { %1338 = vmatprep.subr.mxu1 %v589_v51 }
 0x27c   :  { %v461_v35 = vsub.f32 %v420_v58, %v448_v31  ;;  %v475_v36 = vmul.f32 %v1816_v32, %v1816_v32  ;;  %v476_v37 = vmul.f32 %v1819_v33, %v1819_v33  ;;  %1339 = vmatpush3.msra.mxu1 %v589_v51 }
 0x27d   :  { %1340 = vmatprep.subr.mxu1 %v588_v52 }
 0x27e   :  { %488 = vadd.xlane.f32.xlu1 %v475_v36  ;;  %490 = vadd.xlane.f32.xlu0 %v476_v37  ;;  %v1832_v39 = vmul.f32 %v1788_v0, %v461_v35 }
 0x27f   :  { %1341 = vmatpush3.msra.mxu1 %v588_v52 }
 0x280   :  { %v477_v40 = vmul.f32 %v1832_v39, %v1832_v39  ;;  %1342 = vmatprep.subr.mxu1 %v587_v53 }
 0x281   :  { %1343 = vmatpush3.msra.mxu1 %v587_v53 }
 0x282   :  { %492 = vadd.xlane.f32.xlu1 %v477_v40  ;;  %1344 = vmatprep.subr.mxu1 %v586_v54 }
 0x283   :  { %1345 = vmatpush3.msra.mxu1 %v586_v54  ;;  %v565_v54 = vld [vmem:[#allocation5 + $0x18] sm:$0xff] }
 0x2fb   :  { %v479_v55 = vpop.xlane.xlu0 %478 }
 0x2fc   :  { %v494_v56 = vmul.f32 0.03125, %v479_v55 }
 0x2fe   :  { %v502_v57 = vadd.f32 1e-05, %v494_v56 }
 0x2ff   :  { %v481_v58 = vpop.xlane.xlu1 %480  ;;  %v483_v59 = vpop.xlane.xlu0 %482 }
 0x300   :  { %1439 = vrsqrt.f32 %v502_v57  ;;  %v495_v60 = vmul.f32 0.03125, %v481_v58  ;;  %v496_v61 = vmul.f32 0.03125, %v483_v59 }
 0x302   :  { %v503_v62 = vadd.f32 1e-05, %v495_v60  ;;  %v504_v63 = vadd.f32 1e-05, %v496_v61 }
 0x303   :  { %v485_v1 = vpop.xlane.xlu1 %484  ;;  %v487_v2 = vpop.xlane.xlu0 %486 }
 0x304   :  { %1441 = vrsqrt.f32 %v503_v62  ;;  %v497_v3 = vmul.f32 0.03125, %v485_v1  ;;  %v498_v4 = vmul.f32 0.03125, %v487_v2  ;;  %v567_v2 = vld [vmem:[#allocation5 + $0x28] sm:$0xff] }
 0x305   :  { %1443 = vrsqrt.f32 %v504_v63 }
 0x306   :  { %v505_v5 = vadd.f32 1e-05, %v497_v3  ;;  %v506_v7 = vadd.f32 1e-05, %v498_v4  ;;  %v568_v4 = vld [vmem:[#allocation5 + $0x30] sm:$0xff] }
 0x307   :  { %v489_v8 = vpop.xlane.xlu1 %488  ;;  %v491_v9 = vpop.xlane.xlu0 %490 }
 0x308   :  { %1445 = vrsqrt.f32 %v505_v5  ;;  %v499_v10 = vmul.f32 0.03125, %v489_v8  ;;  %v500_v11 = vmul.f32 0.03125, %v491_v9 }
 0x309   :  { %1447 = vrsqrt.f32 %v506_v7 }
 0x30a   :  { %v507_v12 = vadd.f32 1e-05, %v499_v10  ;;  %v508_v13 = vadd.f32 1e-05, %v500_v11  ;;  %v569_v10 = vld [vmem:[#allocation5 + $0x38] sm:$0xff] }
 0x30b   :  { %v493_v16 = vpop.xlane.xlu1 %492 }
 0x30c   :  { %1449 = vrsqrt.f32 %v507_v12  ;;  %v501_v17 = vmul.f32 0.03125, %v493_v16 }
 0x30d   :  { %v1440_v18 = vpop.eup %1439  ;;  %1451 = vrsqrt.f32 %v508_v13  ;;  %v578_v13 = vld [vmem:[#allocation7] sm:$0xff] }
 0x30e   :  { %v509_v20 = vadd.f32 1e-05, %v501_v17  ;;  %v518_v21 = vmul.f32 %v1440_v18, %v1791_v6 }
 0x310   :  { %1453 = vrsqrt.f32 %v509_v20  ;;  %v532_v23 = vmul.f32 %v1166_v19, %v518_v21 }
 0x311   :  { %v1442_v26 = vpop.eup %1441 }
 0x312   :  { %v1444_v27 = vpop.eup %1443  ;;  %v519_v28 = vmul.f32 %v1442_v26, %v1796_v14  ;;  %v546_v29 = vadd.f32 %v1167_v22, %v532_v23  ;;  %v564_v14 = vld [vmem:[#allocation5 + $0x10] sm:$0xff] }
 0x313   :  { %v520_v31 = vmul.f32 %v1444_v27, %v1799_v15  ;;  %v580_v26 = vld [vmem:[#allocation7 + $0x10] sm:$0xff]  ;;  %v581_v27 = vld [vmem:[#allocation7 + $0x18] sm:$0xff] }
 0x314   :  { %v554_v34 = vmax.f32 %v546_v29, 0.0  ;;  %v533_v35 = vmul.f32 %v1166_v19, %v519_v28  ;;  %v582_v28 = vld [vmem:[#allocation7 + $0x20] sm:$0xff]  ;;  %v583_v29 = vld [vmem:[#allocation7 + $0x28] sm:$0xff] }
 0x315   :  { %v1446_v36 = vpop.eup %1445  ;;  %v534_v37 = vmul.f32 %v1166_v19, %v520_v31  ;;  %v585_v31 = vld [vmem:[#allocation7 + $0x38] sm:$0xff] }
 0x316   :  { %v1448_v38 = vpop.eup %1447  ;;  %v570_v6 = vmul.f32 %v562_v30, %v554_v34  ;;  %v547_v40 = vadd.f32 %v1167_v22, %v533_v35  ;;  %v521_v41 = vmul.f32 %v1446_v36, %v1806_v24  ;;  %v584_v30 = vld [vmem:[#allocation7 + $0x30] sm:$0xff]  ;;  %v1168_v34 = vld [vmem:[%s1976_s10] ss:$0 sm:$0xff] }
 0x317   :  { %v548_v43 = vadd.f32 %v1167_v22, %v534_v37  ;;  %v522_v44 = vmul.f32 %v1448_v38, %v1809_v25  ;;  %v566_v25 = vld [vmem:[#allocation5 + $0x20] sm:$0xff] }
 0x318   :  { %1346 = vmatprep.mubr.f32.mxu1 %v570_v6  ;;  %v555_v45 = vmax.f32 %v547_v40, 0.0  ;;  %v535_v46 = vmul.f32 %v1166_v19, %v521_v41 }
 0x319   :  { %v1450_v47 = vpop.eup %1449  ;;  %v556_v48 = vmax.f32 %v548_v43, 0.0  ;;  %v536_v15 = vmul.f32 %v1166_v19, %v522_v44 }
 0x31a   :  { %v1452_v49 = vpop.eup %1451  ;;  %v571_v50 = vmul.f32 %v563_v42, %v555_v45  ;;  %v549_v51 = vadd.f32 %v1167_v22, %v535_v46  ;;  %v523_v52 = vmul.f32 %v1450_v47, %v1816_v32 }
 0x31b   :  { %v572_v53 = vmul.f32 %v564_v14, %v556_v48  ;;  %v550_v55 = vadd.f32 %v1167_v22, %v536_v15  ;;  %v524_v24 = vmul.f32 %v1452_v49, %v1819_v33  ;;  %v1008_v49 = vld [vmem:[#allocation10 + $0x78] sm:$0xff] }
 0x31c   :  { %1347 = vmatmul.mubr.f32.vlgmr.msra.gmra.mxu1 %v571_v50  ;;  %v557_v56 = vmax.f32 %v549_v51, 0.0  ;;  %v537_v57 = vmul.f32 %v1166_v19, %v523_v52  ;;  %1386 = vmatprep.subr.mxu0 %v1008_v49 }
 0x31d   :  { %v1454_v58 = vpop.eup %1453  ;;  %1349 = vmatprep.mubr.f32.mxu1 %v572_v53  ;;  %v558_v59 = vmax.f32 %v550_v55, 0.0  ;;  %v538_v60 = vmul.f32 %v1166_v19, %v524_v24  ;;  %1387 = vmatpush3.msra.mxu0 %v1008_v49 }
 0x31e   :  { %v573_v61 = vmul.f32 %v565_v54, %v557_v56  ;;  %v551_v62 = vadd.f32 %v1167_v22, %v537_v57  ;;  %v525_v63 = vmul.f32 %v1454_v58, %v1832_v39 }
 0x31f   :  { %v574_v1 = vmul.f32 %v566_v25, %v558_v59  ;;  %v552_v32 = vadd.f32 %v1167_v22, %v538_v60 }
 0x320   :  { %1350 = vmatmul.mubr.f32.gmra.mxu1 %v573_v61  ;;  %v559_v3 = vmax.f32 %v551_v62, 0.0  ;;  %v539_v5 = vmul.f32 %v1166_v19, %v525_v63 }
 0x321   :  { %1352 = vmatprep.mubr.f32.mxu1 %v574_v1  ;;  %v560_v33 = vmax.f32 %v552_v32, 0.0 }
 0x322   :  { %v575_v7 = vmul.f32 %v567_v2, %v559_v3  ;;  %v553_v8 = vadd.f32 %v1167_v22, %v539_v5  ;;  %v579_v22 = vld [vmem:[#allocation7 + $0x8] sm:$0xff] }
 0x323   :  { %v576_v9 = vmul.f32 %v568_v4, %v560_v33 }
 0x324   :  { %1353 = vmatmul.mubr.f32.gmra.mxu1 %v575_v7  ;;  %v561_v11 = vmax.f32 %v553_v8, 0.0 }
 0x325   :  { %1355 = vmatprep.mubr.f32.mxu1 %v576_v9 }
 0x326   :  { %v577_v12 = vmul.f32 %v569_v10, %v561_v11 }
 0x328   :  { %1356 = vmatmul.mubr.f32.gmra.mxu1 %v577_v12 }
 0x329   :  { %1374 = vmatprep.mubr.msk.f32.mxu1 %vm157_vm0, %v578_v13 }
 0x3dc   :  { %v1348_v39 = vpop.f32.mrf.mxu1 }
 0x3de   :  { %v669_v16 = vpop.f32.mrf.mxu1 }
 0x3e0   :  { %v1351_v17 = vpop.f32.mrf.mxu1 }
 0x3e2   :  { %v679_v18 = vpop.f32.mrf.mxu1 }
 0x3e4   :  { %v1354_v20 = vpop.f32.mrf.mxu1 }
 0x3e6   :  { %v689_v19 = vpop.f32.mrf.mxu1 }
 0x3e8   :  { %v1357_v21 = vpop.f32.mrf.mxu1 }
 0x3e9   :  { %1358 = vmatprep.subr.mxu1 %v1357_v21 }
 0x3ea   :  { %v699_v23 = vpop.f32.mrf.mxu1  ;;  %1359 = vmatpush3.msra.mxu1 %v1357_v21 }
 0x3eb   :  { %1360 = vmatprep.subr.mxu1 %v699_v23 }
 0x3ec   :  { %1361 = vmatpush3.msra.mxu1 %v699_v23 }
 0x3ed   :  { %1362 = vmatprep.subr.mxu1 %v1354_v20 }
 0x3ee   :  { %1363 = vmatpush3.msra.mxu1 %v1354_v20 }
 0x3ef   :  { %1364 = vmatprep.subr.mxu1 %v689_v19 }
 0x3f0   :  { %1365 = vmatpush3.msra.mxu1 %v689_v19 }
 0x3f1   :  { %1366 = vmatprep.subr.mxu1 %v1351_v17 }
 0x3f2   :  { %1367 = vmatpush3.msra.mxu1 %v1351_v17 }
 0x3f3   :  { %1368 = vmatprep.subr.mxu1 %v679_v18 }
 0x3f4   :  { %1369 = vmatpush3.msra.mxu1 %v679_v18 }
 0x3f5   :  { %1370 = vmatprep.subr.mxu1 %v1348_v39 }
 0x3f6   :  { %1371 = vmatpush3.msra.mxu1 %v1348_v39 }
 0x3f7   :  { %1372 = vmatprep.subr.mxu1 %v669_v16 }
 0x3f8   :  { %1373 = vmatpush3.msra.mxu1 %v669_v16 }
 0x3f9   :  { %1375 = vmatmul.mubr.msk.f32.vlgmr.msra.gmra.mxu1 %vm157_vm0, %v579_v22 }
 0x3fa   :  { %1377 = vmatprep.mubr.msk.f32.mxu1 %vm157_vm0, %v580_v26  ;;  %v1007_v26 = vld [vmem:[#allocation10 + $0x70] sm:$0xff] }
 0x3fb   :  { %1388 = vmatprep.subr.mxu0 %v1007_v26 }
 0x3fc   :  { %1389 = vmatpush3.msra.mxu0 %v1007_v26 }
 0x3fd   :  { %1378 = vmatmul.mubr.msk.f32.gmra.mxu1 %vm157_vm0, %v581_v27 }
 0x3fe   :  { %1380 = vmatprep.mubr.msk.f32.mxu1 %vm157_vm0, %v582_v28  ;;  %v1006_v28 = vld [vmem:[#allocation10 + $0x68] sm:$0xff] }
 0x3ff   :  { %1390 = vmatprep.subr.mxu0 %v1006_v28 }
 0x400   :  { %1391 = vmatpush3.msra.mxu0 %v1006_v28  ;;  %v978_v28 = vld [vmem:[#allocation8 + $0x8] sm:$0xff] }
 0x401   :  { %1381 = vmatmul.mubr.msk.f32.gmra.mxu1 %vm157_vm0, %v583_v29  ;;  %v1005_v29 = vld [vmem:[#allocation10 + $0x60] sm:$0xff] }
 0x402   :  { %1383 = vmatprep.mubr.msk.f32.mxu1 %vm157_vm0, %v584_v30  ;;  %1392 = vmatprep.subr.mxu0 %v1005_v29  ;;  %v1004_v30 = vld [vmem:[#allocation10 + $0x58] sm:$0xff] }
 0x403   :  { %1393 = vmatpush3.msra.mxu0 %v1005_v29 }
 0x404   :  { %1394 = vmatprep.subr.mxu0 %v1004_v30 }
 0x405   :  { %1384 = vmatmul.mubr.msk.f32.gmra.mxu1 %vm157_vm0, %v585_v31  ;;  %1395 = vmatpush3.msra.mxu0 %v1004_v30  ;;  %v1003_v31 = vld [vmem:[#allocation10 + $0x50] sm:$0xff] }
 0x406   :  { %1396 = vmatprep.subr.mxu0 %v1003_v31 }
 0x407   :  { %1397 = vmatpush3.msra.mxu0 %v1003_v31 }
 0x4b9   :  { %v1376_v35 = vpop.f32.mrf.mxu1 }
 0x4ba   :  { %v810_v36 = vadd.f32 %v1376_v35, %v1168_v34  ;;  %v1000_v35 = vld [vmem:[#allocation10 + $0x38] sm:$0xff] }
 0x4bb   :  { %v804_v37 = vpop.f32.mrf.mxu1 }
 0x4bc   :  { %v805_v38 = vadd.f32 %v1168_v34, %v804_v37  ;;  %847 = vadd.xlane.f32.xlu1 %v810_v36  ;;  %v998_v37 = vld [vmem:[#allocation10 + $0x28] sm:$0xff] }
 0x4bd   :  { %v1379_v6 = vpop.f32.mrf.mxu1 }
 0x4be   :  { %v820_v40 = vadd.f32 %v1379_v6, %v1168_v34  ;;  %845 = vadd.xlane.f32.xlu0 %v805_v38  ;;  %v996_v6 = vld [vmem:[#allocation10 + $0x18] sm:$0xff] }
 0x4bf   :  { %v814_v41 = vpop.f32.mrf.mxu1 }
 0x4c0   :  { %v815_v42 = vadd.f32 %v1168_v34, %v814_v41  ;;  %851 = vadd.xlane.f32.xlu1 %v820_v40  ;;  %v994_v41 = vld [vmem:[#allocation10 + $0x8] sm:$0xff] }
 0x4c1   :  { %v1382_v43 = vpop.f32.mrf.mxu1 }
 0x4c2   :  { %v830_v44 = vadd.f32 %v1382_v43, %v1168_v34  ;;  %849 = vadd.xlane.f32.xlu0 %v815_v42 }
 0x4c3   :  { %v824_v45 = vpop.f32.mrf.mxu1 }
 0x4c4   :  { %v825_v14 = vadd.f32 %v1168_v34, %v824_v45  ;;  %855 = vadd.xlane.f32.xlu1 %v830_v44 }
 0x4c5   :  { %v1385_v46 = vpop.f32.mrf.mxu1 }
 0x4c6   :  { %v840_v47 = vadd.f32 %v1385_v46, %v1168_v34  ;;  %853 = vadd.xlane.f32.xlu0 %v825_v14 }
 0x4c7   :  { %v834_v48 = vpop.f32.mrf.mxu1 }
 0x4c8   :  { %v835_v15 = vadd.f32 %v1168_v34, %v834_v48  ;;  %859 = vadd.xlane.f32.xlu1 %v840_v47  ;;  %v1001_v34 = vld [vmem:[#allocation10 + $0x40] sm:$0xff] }
 0x4ca   :  { %857 = vadd.xlane.f32.xlu0 %v835_v15 }
 0x545   :  { %v848_v50 = vpop.xlane.xlu1 %847 }
 0x546   :  { %v862_v51 = vmul.f32 0.03125, %v848_v50 }
 0x547   :  { %v846_v52 = vpop.xlane.xlu0 %845 }
 0x548   :  { %v870_v53 = vsub.f32 %v810_v36, %v862_v51  ;;  %v861_v54 = vmul.f32 0.03125, %v846_v52  ;;  %v999_v36 = vld [vmem:[#allocation10 + $0x30] sm:$0xff] }
 0x549   :  { %v852_v55 = vpop.xlane.xlu1 %851 }
 0x54a   :  { %v869_v24 = vsub.f32 %v805_v38, %v861_v54  ;;  %v864_v56 = vmul.f32 0.03125, %v852_v55  ;;  %v1904_v25 = vmul.f32 %v1788_v0, %v870_v53  ;;  %v997_v38 = vld [vmem:[#allocation10 + $0x20] sm:$0xff] }
 0x54b   :  { %v850_v57 = vpop.xlane.xlu0 %849 }
 0x54c   :  { %v872_v58 = vsub.f32 %v820_v40, %v864_v56  ;;  %v863_v59 = vmul.f32 0.03125, %v850_v57  ;;  %v886_v60 = vmul.f32 %v1904_v25, %v1904_v25  ;;  %v1909_v61 = vmul.f32 %v1788_v0, %v869_v24  ;;  %v995_v40 = vld [vmem:[#allocation10 + $0x10] sm:$0xff] }
 0x54d   :  { %v856_v62 = vpop.xlane.xlu1 %855 }
 0x54e   :  { %v871_v63 = vsub.f32 %v815_v42, %v863_v59  ;;  %v866_v1 = vmul.f32 0.03125, %v856_v62  ;;  %895 = vadd.xlane.f32.xlu1 %v886_v60  ;;  %v885_v2 = vmul.f32 %v1909_v61, %v1909_v61  ;;  %v1914_v32 = vmul.f32 %v1788_v0, %v872_v58  ;;  %v993_v42 = vld [vmem:[#allocation10] sm:$0xff] }
 0x54f   :  { %v854_v3 = vpop.xlane.xlu0 %853 }
 0x550   :  { %v874_v4 = vsub.f32 %v830_v44, %v866_v1  ;;  %v865_v5 = vmul.f32 0.03125, %v854_v3  ;;  %893 = vadd.xlane.f32.xlu0 %v885_v2  ;;  %v888_v33 = vmul.f32 %v1914_v32, %v1914_v32  ;;  %v1919_v7 = vmul.f32 %v1788_v0, %v871_v63  ;;  %v1177_v3 = vld [vmem:[%s1977_s11] ss:$0 sm:$0xff] }
 0x551   :  { %v860_v8 = vpop.xlane.xlu1 %859 }
 0x552   :  { %v873_v9 = vsub.f32 %v825_v14, %v865_v5  ;;  %v868_v10 = vmul.f32 0.03125, %v860_v8  ;;  %899 = vadd.xlane.f32.xlu1 %v888_v33  ;;  %v887_v11 = vmul.f32 %v1919_v7, %v1919_v7  ;;  %v1924_v12 = vmul.f32 %v1788_v0, %v874_v4  ;;  %v1178_v33 = vld [vmem:[%s1978_s12] ss:$0 sm:$0xff] }
 0x553   :  { %v858_v13 = vpop.xlane.xlu0 %857 }
 0x554   :  { %v876_v39 = vsub.f32 %v840_v47, %v868_v10  ;;  %v867_v16 = vmul.f32 0.03125, %v858_v13  ;;  %897 = vadd.xlane.f32.xlu0 %v887_v11  ;;  %v890_v17 = vmul.f32 %v1924_v12, %v1924_v12  ;;  %v1929_v18 = vmul.f32 %v1788_v0, %v873_v9 }
 0x556   :  { %v875_v20 = vsub.f32 %v835_v15, %v867_v16  ;;  %903 = vadd.xlane.f32.xlu1 %v890_v17  ;;  %v889_v19 = vmul.f32 %v1929_v18, %v1929_v18  ;;  %v1934_v21 = vmul.f32 %v1788_v0, %v876_v39 }
 0x558   :  { %901 = vadd.xlane.f32.xlu0 %v889_v19  ;;  %v892_v23 = vmul.f32 %v1934_v21, %v1934_v21  ;;  %v1939_v22 = vmul.f32 %v1788_v0, %v875_v20  ;;  %v1002_v0 = vld [vmem:[#allocation10 + $0x48] sm:$0xff] }
 0x559   :  { %1398 = vmatprep.subr.mxu0 %v1002_v0 }
 0x55a   :  { %907 = vadd.xlane.f32.xlu1 %v892_v23  ;;  %v891_v27 = vmul.f32 %v1939_v22, %v1939_v22  ;;  %1399 = vmatpush3.msra.mxu0 %v1002_v0  ;;  %v977_v23 = vld [vmem:[#allocation8] sm:$0xff] }
 0x55b   :  { %1400 = vmatprep.subr.mxu0 %v1001_v34 }
 0x55c   :  { %905 = vadd.xlane.f32.xlu0 %v891_v27  ;;  %1401 = vmatpush3.msra.mxu0 %v1001_v34 }
 0x55d   :  { %1402 = vmatprep.subr.mxu0 %v1000_v35 }
 0x55e   :  { %1403 = vmatpush3.msra.mxu0 %v1000_v35 }
 0x55f   :  { %1404 = vmatprep.subr.mxu0 %v999_v36 }
 0x560   :  { %1405 = vmatpush3.msra.mxu0 %v999_v36 }
 0x561   :  { %1406 = vmatprep.subr.mxu0 %v998_v37 }
 0x562   :  { %1407 = vmatpush3.msra.mxu0 %v998_v37  ;;  %v979_v37 = vld [vmem:[#allocation8 + $0x10] sm:$0xff] }
 0x563   :  { %1408 = vmatprep.subr.mxu0 %v997_v38 }
 0x564   :  { %1409 = vmatpush3.msra.mxu0 %v997_v38 }
 0x565   :  { %1410 = vmatprep.subr.mxu0 %v996_v6 }
 0x566   :  { %1411 = vmatpush3.msra.mxu0 %v996_v6 }
 0x567   :  { %1412 = vmatprep.subr.mxu0 %v995_v40 }
 0x568   :  { %1413 = vmatpush3.msra.mxu0 %v995_v40  ;;  %v980_v40 = vld [vmem:[#allocation8 + $0x18] sm:$0xff] }
 0x569   :  { %1414 = vmatprep.subr.mxu0 %v994_v41 }
 0x56a   :  { %1415 = vmatpush3.msra.mxu0 %v994_v41 }
 0x56b   :  { %1416 = vmatprep.subr.mxu0 %v993_v42 }
 0x56c   :  { %1417 = vmatpush3.msra.mxu0 %v993_v42 }
 0x5d7   :  { %v896_v43 = vpop.xlane.xlu1 %895 }
 0x5d8   :  { %v910_v44 = vmul.f32 0.03125, %v896_v43 }
 0x5d9   :  { %v894_v45 = vpop.xlane.xlu0 %893 }
 0x5da   :  { %v918_v14 = vadd.f32 1e-05, %v910_v44  ;;  %v909_v46 = vmul.f32 0.03125, %v894_v45 }
 0x5db   :  { %v900_v47 = vpop.xlane.xlu1 %899 }
 0x5dc   :  { %1455 = vrsqrt.f32 %v918_v14  ;;  %v917_v48 = vadd.f32 1e-05, %v909_v46  ;;  %v912_v15 = vmul.f32 0.03125, %v900_v47  ;;  %v981_v47 = vld [vmem:[#allocation8 + $0x20] sm:$0xff] }
 0x5dd   :  { %v898_v49 = vpop.xlane.xlu0 %897 }
 0x5de   :  { %1457 = vrsqrt.f32 %v917_v48  ;;  %v920_v50 = vadd.f32 1e-05, %v912_v15  ;;  %v911_v51 = vmul.f32 0.03125, %v898_v49  ;;  %v982_v49 = vld [vmem:[#allocation8 + $0x28] sm:$0xff] }
 0x5df   :  { %v904_v52 = vpop.xlane.xlu1 %903 }
 0x5e0   :  { %1459 = vrsqrt.f32 %v920_v50  ;;  %v919_v53 = vadd.f32 1e-05, %v911_v51  ;;  %v914_v54 = vmul.f32 0.03125, %v904_v52 }
 0x5e1   :  { %v902_v55 = vpop.xlane.xlu0 %901 }
 0x5e2   :  { %1461 = vrsqrt.f32 %v919_v53  ;;  %v922_v24 = vadd.f32 1e-05, %v914_v54  ;;  %v913_v56 = vmul.f32 0.03125, %v902_v55  ;;  %v983_v54 = vld [vmem:[#allocation8 + $0x30] sm:$0xff] }
 0x5e3   :  { %v908_v57 = vpop.xlane.xlu1 %907 }
 0x5e4   :  { %1463 = vrsqrt.f32 %v922_v24  ;;  %v921_v58 = vadd.f32 1e-05, %v913_v56  ;;  %v916_v59 = vmul.f32 0.03125, %v908_v57  ;;  %v984_v56 = vld [vmem:[#allocation8 + $0x38] sm:$0xff] }
 0x5e5   :  { %v906_v60 = vpop.xlane.xlu0 %905 }
 0x5e6   :  { %1465 = vrsqrt.f32 %v921_v58  ;;  %v924_v62 = vadd.f32 1e-05, %v916_v59  ;;  %v915_v63 = vmul.f32 0.03125, %v906_v60  ;;  %v1179_v58 = vld [vmem:[%s1981_s15] ss:$0 sm:$0xff]  ;;  %s1134_s15 = sshll.u32 %s1607_s2, 4  ;;  %s1135_s15 = int_to_ptr.vmem [resolvable:$true] %s1134_s15 }
 0x5e7   :  { %s1571_s0 = scalar_lea.vmem %s1135_s15, 1024  ;;  %p1576_p12 = scmp.lt.s32.totalorder %s1135_s15, %s1135_s15 }
 0x5e8   :  { %1467 = vrsqrt.f32 %v924_v62  ;;  %v923_v1 = vadd.f32 1e-05, %v915_v63  ;;  %p1572_p11 = scmp.ne.s32.totalorder %s1135_s15, %s1571_s0  ;;  %p1577_p13 = scmp.lt.s32.totalorder %s1571_s0, %s1571_s0 }
 0x5e9   :  { %v1456_v2 = vpop.eup %1455 }
 0x5ea   :  { %v934_v4 = vmul.f32 %v1456_v2, %v1904_v25  ;;  %1469 = vrsqrt.f32 %v923_v1  ;;  %p1578_p0 = por %p1577_p13, %p1576_p12 }
 0x5eb   :  { %v1458_v5 = vpop.eup %1457 }
 0x5ec   :  { %v933_v8 = vmul.f32 %v1458_v5, %v1909_v61  ;;  %v948_v9 = vmul.f32 %v1177_v3, %v934_v4  ;;  %p1579_p1 = pnand %p1578_p0, %p1572_p11 }
 0x5ed   :  { %v1460_v10 = vpop.eup %1459 }
 0x5ee   :  { %v947_v11 = vmul.f32 %v1177_v3, %v933_v8  ;;  %v962_v13 = vadd.f32 %v1178_v33, %v948_v9  ;;  %v936_v39 = vmul.f32 %v1460_v10, %v1914_v32 }
 0x5ef   :  { %v1462_v16 = vpop.eup %1461 }
 0x5f0   :  { %v961_v17 = vadd.f32 %v1178_v33, %v947_v11  ;;  %v935_v20 = vmul.f32 %v1462_v16, %v1919_v7  ;;  %v950_v19 = vmul.f32 %v1177_v3, %v936_v39  ;;  %v970_v26 = vmax.f32 %v962_v13, 0.0 }
 0x5f1   :  { %v1464_v25 = vpop.eup %1463 }
 0x5f2   :  { %v969_v27 = vmax.f32 %v961_v17, 0.0  ;;  %v949_v29 = vmul.f32 %v1177_v3, %v935_v20  ;;  %v964_v30 = vadd.f32 %v1178_v33, %v950_v19  ;;  %v938_v61 = vmul.f32 %v1464_v25, %v1924_v12 }
 0x5f3   :  { %v1466_v31 = vpop.eup %1465  ;;  %v986_v36 = vmul.f32 %v978_v28, %v970_v26 }
 0x5f4   :  { %v985_v0 = vmul.f32 %v977_v23, %v969_v27  ;;  %v963_v34 = vadd.f32 %v1178_v33, %v949_v29  ;;  %v937_v35 = vmul.f32 %v1466_v31, %v1929_v18  ;;  %v972_v38 = vmax.f32 %v964_v30, 0.0 }
 0x5f5   :  { %v1468_v32 = vpop.eup %1467  ;;  %v952_v7 = vmul.f32 %v1177_v3, %v938_v61 }
 0x5f6   :  { %1418 = vmatprep.mubr.f32.mxu0 %v985_v0  ;;  %v971_v6 = vmax.f32 %v963_v34, 0.0  ;;  %v951_v41 = vmul.f32 %v1177_v3, %v937_v35  ;;  %v940_v42 = vmul.f32 %v1468_v32, %v1934_v21  ;;  %v988_v18 = vmul.f32 %v980_v40, %v972_v38 }
 0x5f7   :  { %v1470_v43 = vpop.eup %1469  ;;  %1419 = vmatmul.mubr.f32.vlgmr.msra.gmra.mxu0 %v986_v36  ;;  %v966_v44 = vadd.f32 %v1178_v33, %v952_v7 }
 0x5f8   :  { %v987_v45 = vmul.f32 %v979_v37, %v971_v6  ;;  %v965_v12 = vadd.f32 %v1178_v33, %v951_v41  ;;  %v939_v14 = vmul.f32 %v1470_v43, %v1939_v22  ;;  %v954_v46 = vmul.f32 %v1177_v3, %v940_v42 }
 0x5f9   :  { %v974_v48 = vmax.f32 %v966_v44, 0.0 }
 0x5fa   :  { %1421 = vmatprep.mubr.f32.mxu0 %v987_v45  ;;  %v973_v15 = vmax.f32 %v965_v12, 0.0  ;;  %v953_v50 = vmul.f32 %v1177_v3, %v939_v14  ;;  %v968_v51 = vadd.f32 %v1178_v33, %v954_v46 }
 0x5fb   :  { %1422 = vmatmul.mubr.f32.gmra.mxu0 %v988_v18  ;;  %v990_v21 = vmul.f32 %v982_v49, %v974_v48 }
 0x5fc   :  { %v989_v52 = vmul.f32 %v981_v47, %v973_v15  ;;  %v967_v53 = vadd.f32 %v1178_v33, %v953_v50  ;;  %v976_v55 = vmax.f32 %v968_v51, 0.0 }
 0x5fe   :  { %1424 = vmatprep.mubr.f32.mxu0 %v989_v52  ;;  %v975_v24 = vmax.f32 %v967_v53, 0.0  ;;  %v992_v57 = vmul.f32 %v984_v56, %v976_v55 }
 0x5ff   :  { %1425 = vmatmul.mubr.f32.gmra.mxu0 %v990_v21 }
 0x600   :  { %v991_v22 = vmul.f32 %v983_v54, %v975_v24 }
 0x602   :  { %1427 = vmatprep.mubr.f32.mxu0 %v991_v22 }
 0x603   :  { %1428 = vmatmul.mubr.f32.gmra.mxu0 %v992_v57 }
 0x6b7   :  { %v1420_v59 = vpop.f32.mrf.mxu0 }
 0x6b8   :  { %v1088_v60 = vadd.f32 %v1420_v59, %v1179_v58 }
 0x6b9   :  { %v1082_v62 = vpop.f32.mrf.mxu0 }
 0x6ba   :  { %1122 = vst [vmem:[#allocation11 + $0x8] sm:$0xff] %v1088_v60  ;;  %v1083_v63 = vadd.f32 %v1179_v58, %v1082_v62 }
 0x6bb   :  { %v1423_v1 = vpop.f32.mrf.mxu0 }
 0x6bc   :  { %1121 = vst [vmem:[#allocation11] sm:$0xff] %v1083_v63  ;;  %v1098_v2 = vadd.f32 %v1423_v1, %v1179_v58 }
 0x6bd   :  { %v1092_v3 = vpop.f32.mrf.mxu0 }
 0x6be   :  { %1124 = vst [vmem:[#allocation11 + $0x18] sm:$0xff] %v1098_v2  ;;  %v1093_v4 = vadd.f32 %v1179_v58, %v1092_v3 }
 0x6bf   :  { %v1426_v5 = vpop.f32.mrf.mxu0 }
 0x6c0   :  { %1123 = vst [vmem:[#allocation11 + $0x10] sm:$0xff] %v1093_v4  ;;  %v1108_v33 = vadd.f32 %v1426_v5, %v1179_v58 }
 0x6c1   :  { %v1102_v8 = vpop.f32.mrf.mxu0 }
 0x6c2   :  { %1126 = vst [vmem:[#allocation11 + $0x28] sm:$0xff] %v1108_v33  ;;  %v1103_v9 = vadd.f32 %v1179_v58, %v1102_v8 }
 0x6c3   :  { %v1429_v10 = vpop.f32.mrf.mxu0 }
 0x6c4   :  { %1125 = vst [vmem:[#allocation11 + $0x20] sm:$0xff] %v1103_v9  ;;  %v1118_v11 = vadd.f32 %v1429_v10, %v1179_v58 }
 0x6c5   :  { %v1112_v13 = vpop.f32.mrf.mxu0 }
 0x6c6   :  { %1128 = vst [vmem:[#allocation11 + $0x38] sm:$0xff] %v1118_v11  ;;  %v1113_v39 = vadd.f32 %v1179_v58, %v1112_v13 }
 0x6c8   :  { %1127 = vst [vmem:[#allocation11 + $0x30] sm:$0xff] %v1113_v39 }
 0x6c9   :  { %1582 = shalt.err (!%p1579_p1)
}
 0x6ca   :  { %1140 = dma.vmem_to_hbm [thread:$0]  %s1135_s15, 1024, %s1982_s16, [#allocation4], %s1601_s26, %s1601_s26, %s1602_s27  }
 0x6cb   :  { %1597 = dma.done.wait [#allocation4], 1024  }
 0x6cc   :  { %1598 = vsyncadd [#allocation4], 4294966272 }
 0x6cd   :  { %1144 = vsyncpa [#allocation3], 1 }
 0x6ce   :  { %1145 = vsyncpa [#allocation6], 1 }
 0x6cf   :  { %1146 = vsyncpa [#allocation9], 1 }
 0x6d0   :  { %1147 = vsyncpa [#allocation4], 1 }

</bundles_post_ra>
